<compile_context>
chip_gen: v5e
topology: v5e:2x2
jax: 0.10.0
libtpu: 0.0.40
codegen_flags: <defaults>
</compile_context>

<pallas_src>
import functools

import jax
import jax.numpy as jnp
from jax.experimental import pallas as pl
from jax.experimental.pallas import tpu as pltpu

_LANE = 128
_MAX_BLOCK_ROWS = 1024   # (1024, 128) f32 block = 512 KiB
_NUM_CORE_SPLITS = 2     # leading "parallel" grid axis (megacore on v7x)


def _dice_kernel(meta_ref, p_ref, t_ref, o_it_ref, o_pt_ref, acc_it, acc_pt,
                 *, block_rows, steps):
    """Streaming reduction: accumulate p*t and p+t elementwise on the VPU;
    reduce to scalars and write lane-dense partials only in the epilogue."""
    c = pl.program_id(0)          # "parallel" core split
    s = pl.program_id(1)          # "arbitrary" reduction axis

    @pl.when(s == 0)
    def _init():
        acc_it[...] = jnp.zeros_like(acc_it)
        acc_pt[...] = jnp.zeros_like(acc_pt)

    # Logical (un-clamped) block index; rows at/after the valid count are
    # masked to zero so clamped/partial edge blocks contribute nothing.
    logical_block = c * steps + s
    base_row = logical_block * block_rows
    row_ids = base_row + jax.lax.broadcasted_iota(
        jnp.int32, (block_rows, _LANE), 0)
    mask = row_ids < meta_ref[0]

    p = jnp.where(mask, p_ref[...].astype(jnp.float32), 0.0)
    t = jnp.where(mask, t_ref[...].astype(jnp.float32), 0.0)

    acc_it[...] += p * t        # intersection partials
    acc_pt[...] += p + t        # sum(p) + sum(t) partials

    @pl.when(s == pl.num_programs(1) - 1)
    def _finalize():
        inter = jnp.sum(acc_it[...])
        psum = jnp.sum(acc_pt[...])
        o_it_ref[...] = jnp.full(o_it_ref.shape, inter, jnp.float32)
        o_pt_ref[...] = jnp.full(o_pt_ref.shape, psum, jnp.float32)


def dice_loss(predicted_probs, target_mask, smooth=1.0):
    """JAX/Pallas equivalent of DiceLoss.forward (returns a float32 scalar)."""
    p = jnp.reshape(predicted_probs, (-1,))
    t = jnp.reshape(target_mask, (-1,))
    n = p.shape[0]

    # Only pad to a lane multiple (<=127 zeros); zeros do not perturb any sum.
    pad = (-n) % _LANE
    if pad:
        p = jnp.pad(p, (0, pad))
        t = jnp.pad(t, (0, pad))
    rows = (n + pad) // _LANE
    p2 = p.reshape(rows, _LANE)   # free reshape of contiguous data
    t2 = t.reshape(rows, _LANE)

    # Block rows: big tile when possible, otherwise the full (possibly
    # non-multiple-of-8) row extent, which is always a legal block shape.
    block_rows = rows if rows < _MAX_BLOCK_ROWS else _MAX_BLOCK_ROWS
    num_blocks = pl.cdiv(rows, block_rows)
    steps = pl.cdiv(num_blocks, _NUM_CORE_SPLITS)

    # Scalar prefetch: [valid row count, max legal block index].
    meta = jnp.array([rows, num_blocks - 1], dtype=jnp.int32)

    def in_map(c, s, meta_ref):
        # Clamp so the DMA never targets a fully out-of-range block; the
        # in-kernel mask (based on the un-clamped logical index) zeroes it.
        return (jnp.minimum(c * steps + s, meta_ref[1]), 0)

    kernel = functools.partial(_dice_kernel, block_rows=block_rows, steps=steps)

    out_it, out_pt = pl.pallas_call(
        kernel,
        out_shape=(
            jax.ShapeDtypeStruct((_NUM_CORE_SPLITS, 8, _LANE), jnp.float32),
            jax.ShapeDtypeStruct((_NUM_CORE_SPLITS, 8, _LANE), jnp.float32),
        ),
        grid_spec=pltpu.PrefetchScalarGridSpec(
            num_scalar_prefetch=1,
            grid=(_NUM_CORE_SPLITS, steps),
            in_specs=[
                pl.BlockSpec((block_rows, _LANE), in_map),
                pl.BlockSpec((block_rows, _LANE), in_map),
            ],
            out_specs=(
                pl.BlockSpec((1, 8, _LANE), lambda c, s, meta_ref: (c, 0, 0)),
                pl.BlockSpec((1, 8, _LANE), lambda c, s, meta_ref: (c, 0, 0)),
            ),
            scratch_shapes=[
                pltpu.VMEM((block_rows, _LANE), jnp.float32),
                pltpu.VMEM((block_rows, _LANE), jnp.float32),
            ],
        ),
        compiler_params=pltpu.CompilerParams(
            dimension_semantics=("parallel", "arbitrary")),
    )(meta, p2, t2)

    # Tiny epilogue in the wrapper: combine per-core partials + dice formula.
    inter = jnp.sum(out_it[:, 0, 0])
    psum = jnp.sum(out_pt[:, 0, 0])
    dice_coeff = (2.0 * inter + smooth) / (psum + smooth)
    return 1.0 - dice_coeff


def _dice_loss_ref(p, t, smooth=1.0):
    p = jnp.reshape(p, (-1,)).astype(jnp.float32)
    t = jnp.reshape(t, (-1,)).astype(jnp.float32)
    inter = jnp.sum(p * t)
    return 1.0 - (2.0 * inter + smooth) / (jnp.sum(p) + jnp.sum(t) + smooth)


if __name__ == "__main__":
    key = jax.random.PRNGKey(0)
    k1, k2, k3, k4, k5, k6 = jax.random.split(key, 6)

    # Case 1: NCHW f32 probs / binary mask.
    B, C, H, W = 2, 4, 16, 16
    probs1 = jax.nn.sigmoid(jax.random.normal(k1, (B, C, H, W), jnp.float32))
    mask1 = (jax.random.uniform(k2, (B, C, H, W)) > 0.5).astype(jnp.float32)

    # Case 2: element count not a multiple of 128 (exercises tail masking).
    probs2 = jax.nn.sigmoid(jax.random.normal(k3, (3, 1, 10, 10), jnp.float32))
    mask2 = (jax.random.uniform(k4, (3, 1, 10, 10)) > 0.5).astype(jnp.float32)

    # Case 3: bf16 inputs kept in bf16 in HBM (in-kernel f32 accumulation).
    probs3 = jax.nn.sigmoid(
        jax.random.normal(k5, (B, C, H, W), jnp.float32)).astype(jnp.bfloat16)
    mask3 = (jax.random.uniform(k6, (B, C, H, W)) > 0.5).astype(jnp.bfloat16)

    for probs, tgt in ((probs1, mask1), (probs2, mask2), (probs3, mask3)):
        loss = jax.block_until_ready(dice_loss(probs, tgt, smooth=1.0))
        ref = _dice_loss_ref(probs, tgt, smooth=1.0)
        assert jnp.allclose(loss, ref, atol=1e-4, rtol=1e-4), (loss, ref)

    print("KERNEL_OK")
</pallas_src>

<mosaic_0001>
module attributes {stable_mosaic.version = 11 : i64} {
  func.func @_dice_kernel(%arg0: i32, %arg1: i32, %arg2: memref<2xi32, #tpu.memory_space<smem>>, %arg3: memref<16x128xf32, #tpu.memory_space<vmem>>, %arg4: memref<16x128xf32, #tpu.memory_space<vmem>>, %arg5: memref<1x8x128xf32, #tpu.memory_space<vmem>>, %arg6: memref<1x8x128xf32, #tpu.memory_space<vmem>>, %arg7: memref<16x128xf32, #tpu.memory_space<vmem>>, %arg8: memref<16x128xf32, #tpu.memory_space<vmem>>) attributes {dimension_semantics = [#tpu.dimension_semantics<parallel>, #tpu.dimension_semantics<arbitrary>], iteration_bounds = array<i64: 2, 1>, scalar_prefetch = 1 : i64, scratch_operands = 2 : i64, tpu.core_type = #tpu.core_type<tc>, window_params = [{transform_indices = @transform_0, window_bounds = array<i64: 16, 128>}, {transform_indices = @transform_1, window_bounds = array<i64: 16, 128>}, {transform_indices = @transform_2, window_bounds = array<i64: 1, 8, 128>}, {transform_indices = @transform_3, window_bounds = array<i64: 1, 8, 128>}]} {
    %c0_i32 = arith.constant 0 : i32
    %0 = arith.cmpi eq, %arg1, %c0_i32 : i32
    %1 = arith.extui %0 : i1 to i32
    %c0_i32_0 = arith.constant 0 : i32
    %2 = arith.cmpi ne, %1, %c0_i32_0 : i32
    scf.if %2 {
      %cst_16 = arith.constant 0.000000e+00 : f32
      %29 = vector.broadcast %cst_16 : f32 to vector<16x128xf32>
      %c0_17 = arith.constant 0 : index
      %c0_18 = arith.constant 0 : index
      %30 = vector.load %arg7[%c0_17, %c0_18] : memref<16x128xf32, #tpu.memory_space<vmem>>, vector<16x128xf32>
      tpu.vector_store %arg7[%c0_17, %c0_18], %29 {strides = array<i32>} : memref<16x128xf32, #tpu.memory_space<vmem>>, vector<16x128xf32>,
      %cst_19 = arith.constant 0.000000e+00 : f32
      %31 = vector.broadcast %cst_19 : f32 to vector<16x128xf32>
      %c0_20 = arith.constant 0 : index
      %c0_21 = arith.constant 0 : index
      %32 = vector.load %arg8[%c0_20, %c0_21] : memref<16x128xf32, #tpu.memory_space<vmem>>, vector<16x128xf32>
      tpu.vector_store %arg8[%c0_20, %c0_21], %31 {strides = array<i32>} : memref<16x128xf32, #tpu.memory_space<vmem>>, vector<16x128xf32>,
    } else {
    }
    %c1_i32 = arith.constant 1 : i32
    %3 = arith.muli %arg0, %c1_i32 : i32
    %4 = arith.addi %3, %arg1 : i32
    %c16_i32 = arith.constant 16 : i32
    %5 = arith.muli %4, %c16_i32 : i32
    %6 = tpu.iota {dimensions = array<i32: 0>} : vector<16x128xi32>
    %7 = vector.broadcast %5 : i32 to vector<16x128xi32>
    %8 = arith.addi %7, %6 : vector<16x128xi32>
    %c0 = arith.constant 0 : index
    %9 = memref.load %arg2[%c0] : memref<2xi32, #tpu.memory_space<smem>>
    %10 = vector.broadcast %9 : i32 to vector<16x128xi32>
    %11 = arith.cmpi slt, %8, %10 : vector<16x128xi32>
    %c0_1 = arith.constant 0 : index
    %c0_2 = arith.constant 0 : index
    %12 = vector.load %arg3[%c0_1, %c0_2] : memref<16x128xf32, #tpu.memory_space<vmem>>, vector<16x128xf32>
    %cst = arith.constant 0.000000e+00 : f32
    %13 = vector.broadcast %cst : f32 to vector<16x128xf32>
    %14 = arith.select %11, %12, %13 : vector<16x128xi1>, vector<16x128xf32>
    %c0_3 = arith.constant 0 : index
    %c0_4 = arith.constant 0 : index
    %15 = vector.load %arg4[%c0_3, %c0_4] : memref<16x128xf32, #tpu.memory_space<vmem>>, vector<16x128xf32>
    %cst_5 = arith.constant 0.000000e+00 : f32
    %16 = vector.broadcast %cst_5 : f32 to vector<16x128xf32>
    %17 = arith.select %11, %15, %16 : vector<16x128xi1>, vector<16x128xf32>
    %c0_6 = arith.constant 0 : index
    %c0_7 = arith.constant 0 : index
    %18 = vector.load %arg7[%c0_6, %c0_7] : memref<16x128xf32, #tpu.memory_space<vmem>>, vector<16x128xf32>
    %19 = arith.mulf %14, %17 : vector<16x128xf32>
    %20 = arith.addf %18, %19 : vector<16x128xf32>
    %c0_8 = arith.constant 0 : index
    %c0_9 = arith.constant 0 : index
    %21 = vector.load %arg7[%c0_8, %c0_9] : memref<16x128xf32, #tpu.memory_space<vmem>>, vector<16x128xf32>
    tpu.vector_store %arg7[%c0_8, %c0_9], %20 {strides = array<i32>} : memref<16x128xf32, #tpu.memory_space<vmem>>, vector<16x128xf32>,
    %c0_10 = arith.constant 0 : index
    %c0_11 = arith.constant 0 : index
    %22 = vector.load %arg8[%c0_10, %c0_11] : memref<16x128xf32, #tpu.memory_space<vmem>>, vector<16x128xf32>
    %23 = arith.addf %14, %17 : vector<16x128xf32>
    %24 = arith.addf %22, %23 : vector<16x128xf32>
    %c0_12 = arith.constant 0 : index
    %c0_13 = arith.constant 0 : index
    %25 = vector.load %arg8[%c0_12, %c0_13] : memref<16x128xf32, #tpu.memory_space<vmem>>, vector<16x128xf32>
    tpu.vector_store %arg8[%c0_12, %c0_13], %24 {strides = array<i32>} : memref<16x128xf32, #tpu.memory_space<vmem>>, vector<16x128xf32>,
    %c0_i32_14 = arith.constant 0 : i32
    %26 = arith.cmpi eq, %arg1, %c0_i32_14 : i32
    %27 = arith.extui %26 : i1 to i32
    %c0_i32_15 = arith.constant 0 : i32
    %28 = arith.cmpi ne, %27, %c0_i32_15 : i32
    scf.if %28 {
      %c0_16 = arith.constant 0 : index
      %c0_17 = arith.constant 0 : index
      %29 = vector.load %arg7[%c0_16, %c0_17] : memref<16x128xf32, #tpu.memory_space<vmem>>, vector<16x128xf32>
      %30 = vector.shape_cast %29 : vector<16x128xf32> to vector<1x16x128xf32>
      %cst_18 = arith.constant dense<0.000000e+00> : vector<1xf32>
      %31 = vector.multi_reduction <add>, %30, %cst_18 [1, 2] : vector<1x16x128xf32> to vector<1xf32>
      %32 = vector.shape_cast %31 : vector<1xf32> to vector<1x1x1xf32>
      %33 = vector.extract %32[0, 0, 0] : f32 from vector<1x1x1xf32>
      %c0_19 = arith.constant 0 : index
      %c0_20 = arith.constant 0 : index
      %34 = vector.load %arg8[%c0_19, %c0_20] : memref<16x128xf32, #tpu.memory_space<vmem>>, vector<16x128xf32>
      %35 = vector.shape_cast %34 : vector<16x128xf32> to vector<1x16x128xf32>
      %cst_21 = arith.constant dense<0.000000e+00> : vector<1xf32>
      %36 = vector.multi_reduction <add>, %35, %cst_21 [1, 2] : vector<1x16x128xf32> to vector<1xf32>
      %37 = vector.shape_cast %36 : vector<1xf32> to vector<1x1x1xf32>
      %38 = vector.extract %37[0, 0, 0] : f32 from vector<1x1x1xf32>
      %39 = vector.broadcast %33 : f32 to vector<1x8x128xf32>
      %c0_22 = arith.constant 0 : index
      %c0_23 = arith.constant 0 : index
      %c0_24 = arith.constant 0 : index
      %40 = vector.load %arg5[%c0_22, %c0_23, %c0_24] : memref<1x8x128xf32, #tpu.memory_space<vmem>>, vector<1x8x128xf32>
      tpu.vector_store %arg5[%c0_22, %c0_23, %c0_24], %39 {strides = array<i32>} : memref<1x8x128xf32, #tpu.memory_space<vmem>>, vector<1x8x128xf32>,
      %41 = vector.broadcast %38 : f32 to vector<1x8x128xf32>
      %c0_25 = arith.constant 0 : index
      %c0_26 = arith.constant 0 : index
      %c0_27 = arith.constant 0 : index
      %42 = vector.load %arg6[%c0_25, %c0_26, %c0_27] : memref<1x8x128xf32, #tpu.memory_space<vmem>>, vector<1x8x128xf32>
      tpu.vector_store %arg6[%c0_25, %c0_26, %c0_27], %41 {strides = array<i32>} : memref<1x8x128xf32, #tpu.memory_space<vmem>>, vector<1x8x128xf32>,
    } else {
    }
    return
  }
  func.func @transform_0(%arg0: i32, %arg1: i32, %arg2: memref<2xi32, #tpu.memory_space<smem>>) -> (i32, i32) {
    %c1_i32 = arith.constant 1 : i32
    %0 = arith.muli %arg0, %c1_i32 : i32
    %1 = arith.addi %0, %arg1 : i32
    %c1 = arith.constant 1 : index
    %2 = memref.load %arg2[%c1] : memref<2xi32, #tpu.memory_space<smem>>
    %3 = arith.minsi %1, %2 : i32
    %c0_i32 = arith.constant 0 : i32
    %c0_i32_0 = arith.constant 0 : i32
    return %3, %c0_i32 : i32, i32
  }
  func.func @transform_1(%arg0: i32, %arg1: i32, %arg2: memref<2xi32, #tpu.memory_space<smem>>) -> (i32, i32) {
    %c1_i32 = arith.constant 1 : i32
    %0 = arith.muli %arg0, %c1_i32 : i32
    %1 = arith.addi %0, %arg1 : i32
    %c1 = arith.constant 1 : index
    %2 = memref.load %arg2[%c1] : memref<2xi32, #tpu.memory_space<smem>>
    %3 = arith.minsi %1, %2 : i32
    %c0_i32 = arith.constant 0 : i32
    %c0_i32_0 = arith.constant 0 : i32
    return %3, %c0_i32 : i32, i32
  }
  func.func @transform_2(%arg0: i32, %arg1: i32, %arg2: memref<2xi32, #tpu.memory_space<smem>>) -> (i32, i32, i32) {
    %c0_i32 = arith.constant 0 : i32
    %c0_i32_0 = arith.constant 0 : i32
    %c0_i32_1 = arith.constant 0 : i32
    return %arg0, %c0_i32, %c0_i32_0 : i32, i32, i32
  }
  func.func @transform_3(%arg0: i32, %arg1: i32, %arg2: memref<2xi32, #tpu.memory_space<smem>>) -> (i32, i32, i32) {
    %c0_i32 = arith.constant 0 : i32
    %c0_i32_0 = arith.constant 0 : i32
    %c0_i32_1 = arith.constant 0 : i32
    return %arg0, %c0_i32, %c0_i32_0 : i32, i32, i32
  }
}

</mosaic_0001>

<bundles_post_ra>
// kernel: tpu_custom_call.1
= control target key start
LH: loop header
LB: loop body
LE: loop exit
PB: predicated region body
PF: predicated region fallthrough
CT: control target
= control target key end

     0   :  { %s942_s18 = smov [#allocation5]   ;;  %s1259_s0 = inlined_call_operand.hbm [shape: s32[2], index: 0, kind: input, shape index: {}]   ;;  %s1260_s1 = inlined_call_operand.hbm [shape: f32[16,128], index: 1, kind: input, shape index: {}]   ;;  %s1261_s2 = inlined_call_operand.hbm [shape: f32[16,128], index: 2, kind: input, shape index: {}]   ;;  %s1262_s3 = inlined_call_operand.hbm [shape: f32[2,8,128], index: 3, kind: output, shape index: {0}]   ;;  %s1263_s4 = inlined_call_operand.hbm [shape: f32[2,8,128], index: 4, kind: output, shape index: {1}]  }
   0x1   :  { %s11_s17 = sshll.u32 %s1259_s0, 4  ;;  %s12_s17 = int_to_ptr.hbm [resolvable:$true] %s11_s17 }
   0x2   :  { %14 = dma.hbm_to_smem %s12_s17, 16, %s942_s18, [#allocation4] }
   0x3   :  { %876 = dma.done.wait [#allocation4], 16 }
   0x4   :  { %877 = vsyncadd [#allocation4], 4294967280 }
   0x5   :  { %17 = sfence }
   0x6   :  { %18 = vsyncpa [#allocation7], 0 }
   0x7   :  { %20 = vsyncpa [#allocation7 + $0x1], 0 }
   0x8   :  { %21 = vsyncpa [#allocation10], 0 }
   0x9   :  { %23 = vsyncpa [#allocation10 + $0x1], 0 }
   0xa   :  { %24 = vsyncpa [#allocation8], 0 }
   0xb   :  { %26 = vsyncpa [#allocation8 + $0x1], 0 }
   0xc   :  { %27 = vsyncpa [#allocation13], 0 }
   0xd   :  { %29 = vsyncpa [#allocation13 + $0x1], 0  ;;  %s973_s19 = smov 0   ;;  %s975_s20 = smov 0  }
   0xe   :  { %s977_s21 = smov 0   ;;  %s979_s0 = smov 0  }
   0xf   :  { %s981_s22 = smov 0   ;;  %s983_s23 = smov 0  }
  0x10   :  { %s985_s24 = smov 0   ;;  %s987_s25 = smov 0  }
  0x11   :  { %s989_s26 = smov 0   ;;  %s991_s27 = smov 0  }
  0x12   :  { %s993_s28 = smov 0   ;;  %s995_s29 = smov 0  }
  0x13 LB: > { %1272 = sst [smem:[#allocation19_spill]] %s904_s21  ;;  %s543_s30 = sadd.s32 4294967295, %s940_s29   ;;  %s940_s29 = sphi %s995_s29, %s35_s29   ;;  %s936_s28 = sphi %s993_s28, %s1308_s28   ;;  %s932_s27 = sphi %s991_s27, %s1299_s27   ;;  %s928_s26 = sphi %s989_s26, %s1298_s26   ;;  %s924_s25 = sphi %s987_s25, %s1307_s25   ;;  %s920_s24 = sphi %s985_s24, %s1306_s24   ;;  %s916_s23 = sphi %s983_s23, %s1305_s23   ;;  %s912_s22 = sphi %s981_s22, %s1304_s22   ;;  %s908_s0 = sphi %s979_s0, %s1303_s0   ;;  %s904_s21 = sphi %s977_s21, %s1296_s21   ;;  %s900_s20 = sphi %s975_s20, %s1302_s20   ;;  %s896_s19 = sphi %s973_s19, %s1301_s19  }
  0x14   : > { %1273 = sst [smem:[#allocation20_spill]] %s928_s26  ;;  %s544_s5 = sadd.s32 4294967294, %s940_s29  }
  0x15   : > { %1274 = sst [smem:[#allocation21_spill]] %s936_s28  ;;  %s47_s6 = sadd.s32 1, %s936_s28 }
  0x16   : > { %s545_s7 = sld [smem:[#allocation5 + $0x1]]  ;;  %p49_p0 = scmp.ge.s32.totalorder %s47_s6, 2 }
  0x17   : > { %s62_s8 = sadd.s32 1, %s928_s26  ;;  %p69_p1 = scmp.ne.s32.totalorder %s928_s26, %s924_s25 }
  0x18   : > { %p1270_p2 = scmp.eq.s32.totalorder %s940_s29, 0  ;;  %s1310_s6 = smov (%p49_p0, %s47_s6), 0 }
  0x19   : > { %1275 = sst [smem:[#allocation22_spill]] %s1310_s6  ;;  %p75_p4 = scmp.ne.s32.totalorder %s924_s25, %s920_s24 }
  0x1a   : > { %p1042_p3 = por %p1270_p2, %p69_p1  ;;  %p1047_p5 = scmp.eq.s32.totalorder %s543_s30, 0 }
  0x1b   : > { %s119_s11 = ssub.s32 %s936_s28, %s1310_s6  ;;  %s122_s15 = sadd.s32 1, %s904_s21 }
  0x1c   : > { %p53_p6 = scmp.lt.s32.totalorder %s936_s28, %s545_s7  ;;  %p57_p7 = scmp.lt.s32.totalorder %s1310_s6, %s545_s7 }
  0x1d   : > { %p1057_p8 = por %p1047_p5, %p75_p4  ;;  %p120_p9 = scmp.eq.s32.totalorder %s119_s11, 0 }
  0x1e   : > { %s1062_s13 = scalar_select %p53_p6, %s936_s28, %s545_s7 }
  0x1f   : > { %s58_s14 = scalar_select %p57_p7, %s1310_s6, %s545_s7 }
  0x20   : > { %p132_p10 = scmp.ne.s32.totalorder %s904_s21, %s900_s20  ;;  %p133_p11 = scmp.eq.s32.totalorder %s543_s30, 1 }
  0x21   : > { %s59_s16 = ssub.s32 %s1062_s13, %s58_s14  ;;  %p138_p13 = scmp.ne.s32.totalorder %s900_s20, %s896_s19 }
  0x22   : > { %p1069_p12 = scmp.eq.s32.totalorder %s59_s16, 0  ;;  %p1083_p0 = por %p133_p11, %p132_p10 }
  0x23   : > { %s1076_s18 = scalar_select %p120_p9, %s904_s21, %s122_s15  }
  0x24   : > { %s1081_s24 = scalar_select %p1069_p12, %s928_s26, %s62_s8  }
  0x25   : > { %1280 = sst [smem:[#allocation23_spill]] %s1076_s18  ;;  %p139_p1 = scmp.eq.s32.totalorder %s544_s5, 1 }
  0x26   : > { %1281 = sst [smem:[#allocation24_spill]] %s1081_s24  ;;  %p1269_p6 = scmp.lt.s32.totalorder %s940_s29, 2 }
  0x27   : > { %p1089_p7 = por %p139_p1, %p138_p13  ;;  %s185_s11 = sand.u32 1, %s928_s26  }
  0x28   : > { %s551_s14 = sshll.u32 %s185_s11, 4  ;;  %s571_s15 = sshll.u32 %s1062_s13, 4 }
  0x29   : > { %s1283_s30 = scalar_select %p1089_p7, 1, 0 }
  0x2a   : > { %s198_s8 = scalar_lea.hbm %s1260_s1, %s571_s15  ;;  %s189_s28 = scalar_lea.vmem [#allocation6], %s551_s14 }
  0x2b   : > { %1284 = sst [smem:[#allocation25_spill]] %s1283_s30  ;;  %s201_s24 = sshll.u32 %s189_s28, 4  ;;  %s202_s24 = int_to_ptr.vmem [resolvable:$true] %s201_s24 }
  0x2c   : > { %s199_s18 = sshll.u32 %s198_s8, 4  ;;  %p1104_p9 = pnand %p1269_p6, %p1042_p3  ;;  %s200_s18 = int_to_ptr.hbm [resolvable:$true] %s199_s18 }
  0x2d   : > { %s186_s26 = scalar_lea.sflag [#allocation7], %s185_s11  ;;  %s712_s21 = sshra.s32 %s200_s18, 4  ;;  %s713_s21 = int_to_ptr.hbm [resolvable:$true] %s712_s21 }
  0x2e   : > { %s714_s30 = scalar_lea.hbm %s713_s21, 16  ;;  %p716_p13 = pneg %p1104_p9 }
  0x2f   : > { %p715_p11 = scmp.ne.s32.totalorder %s713_s21, %s714_s30  ;;  %s719_s9 = scalar_lea.hbm %s1260_s1, 16 }
  0x30   : > { %p720_p3 = scmp.lt.s32.totalorder %s713_s21, %s1260_s1  ;;  %p721_p6 = scmp.lt.s32.totalorder %s719_s9, %s714_s30 }
  0x31   : > { %p717_p1 = pnand %p716_p13, %p715_p11 }
  0x32   : > { %p722_p2 = por %p721_p6, %p720_p3 }
  0x33   : > { %p718_p4 = pneg %p717_p1 }
  0x35   : > { %p723_p10 = pnand %p722_p2, %p718_p4 }
  0x37   : > { %726 = shalt.err (!%p723_p10)
}
  0x38   : > { %s1271_s11 = smov 128   ;;  %s944_s21 = smov 8  }
  0x39   : > { %588 = dma.hbm_to_vmem [thread:$0]  (!%p1104_p9), %s200_s18, 256, %s202_s24, %s186_s26, %s1271_s11, %s1271_s11, %s944_s21  }
  0x3a   : > { %p235_p2 = scmp.lt.s32.totalorder %s940_s29, 3  ;;  %p1286_p4 = scmp.ge.s32.totalorder %s940_s29, 1 }
  0x3b   : > { %s96_s8 = sadd.s32 1, %s916_s23  ;;  %p103_p10 = scmp.ne.s32.totalorder %s916_s23, %s912_s22 }
  0x3c   : > { %p1125_p6 = pnand %p1286_p4, %p235_p2  ;;  %p1288_p11 = scmp.eq.s32.totalorder %s940_s29, 0 }
  0x3d   : > { %s1135_s28 = scalar_select %p1069_p12, %s916_s23, %s96_s8  }
  0x3e   : > { %p105_p13 = por %p103_p10, %p1288_p11  ;;  %p109_p1 = scmp.ne.s32.totalorder %s912_s22, %s908_s0 }
  0x3f   : > { %s211_s5 = sand.u32 1, %s916_s23   ;;  %s224_s9 = scalar_lea.hbm %s1261_s2, %s571_s15 }
  0x40   : > { %p1144_p3 = por %p109_p1, %p1047_p5  ;;  %s555_s26 = sshll.u32 %s211_s5, 4 }
  0x41   : > { %s225_s14 = sshll.u32 %s224_s9, 4  ;;  %s215_s17 = scalar_lea.vmem [#allocation9], %s555_s26  ;;  %s226_s14 = int_to_ptr.hbm [resolvable:$true] %s225_s14 }
  0x42   : > { %s227_s16 = sshll.u32 %s215_s17, 4  ;;  %p1290_p12 = scmp.lt.s32.totalorder %s940_s29, 2  ;;  %s228_s16 = int_to_ptr.vmem [resolvable:$true] %s227_s16 }
  0x43   : > { %s212_s10 = scalar_lea.sflag [#allocation10], %s211_s5  ;;  %s742_s8 = sshra.s32 %s226_s14, 4  ;;  %s743_s8 = int_to_ptr.hbm [resolvable:$true] %s742_s8 }
  0x44   : > { %p1155_p9 = pnand %p1290_p12, %p105_p13  ;;  %s744_s11 = scalar_lea.hbm %s743_s8, 16 }
  0x45   : > { %p745_p5 = scmp.ne.s32.totalorder %s743_s8, %s744_s11  ;;  %s749_s26 = scalar_lea.hbm %s1261_s2, 16 }
  0x46   : > { %p746_p2 = pneg %p1155_p9  ;;  %p750_p11 = scmp.lt.s32.totalorder %s743_s8, %s1261_s2 }
  0x47   : > { %p751_p13 = scmp.lt.s32.totalorder %s749_s26, %s744_s11 }
  0x48   : > { %p747_p4 = pnand %p746_p2, %p745_p5 }
  0x49   : > { %p752_p1 = por %p751_p13, %p750_p11 }
  0x4a   : > { %p748_p10 = pneg %p747_p4 }
  0x4c   : > { %p753_p12 = pnand %p752_p1, %p748_p10 }
  0x4e   : > { %756 = shalt.err (!%p753_p12)
}
  0x4f   : > { %s1292_s5 = smov 128   ;;  %239 = sbr.rel (%p1125_p6) target bundleno = 299 (0x12b), region = 28 }
  0x50   : > { %591 = dma.hbm_to_vmem [thread:$0]  (!%p1155_p9), %s226_s14, 256, %s228_s16, %s212_s10, %s1292_s5, %s1292_s5, %s944_s21  }
  0x51   : > { %s241_s9 = sand.u32 (!%p1125_p6), 1, %s924_s25  }
  0x52   : > { %s560_s17 = sshll.u32 (!%p1125_p6), %s241_s9, 4  ;;  %s242_s13 = scalar_lea.sflag (!%p1125_p6), [#allocation7], %s241_s9 }
  0x53   : > { %s245_s15 = scalar_lea.vmem (!%p1125_p6), [#allocation6], %s560_s17 }
  0x54   : > { %879 = dma.done.wait (%p1057_p8), %s242_s13, 256  }
  0x55   : > { %881 = vsyncadd (%p1057_p8), %s242_s13, 4294967040  ;;  %s251_s11 = sand.u32 1, %s912_s22  }
  0x56   : > { %s561_s0 = sshll.u32 %s251_s11, 4  ;;  %s252_s8 = scalar_lea.sflag [#allocation10], %s251_s11 }
  0x57   : > { %s255_s21 = scalar_lea.vmem [#allocation9], %s561_s0 }
  0x58   : > { %883 = dma.done.wait (%p1144_p3), %s252_s8, 256  }
  0x59   : > { %885 = vsyncadd (%p1144_p3), %s252_s8, 4294967040  ;;  %s564_s30 = sshll.u32 %s932_s27, 4  ;;  %v309_v0 = vlaneseq  ;;  %s315_s14 = sld [smem:[#allocation5]]  ;;  %v319_v7 = vld [vmem:[%s245_s15] sm:$0xff]  ;;  %v320_v8 = vld [vmem:[%s245_s15 + $0x8] sm:$0xff] }
  0x5a   : > { %v312_v1 = vstv %s564_s30  ;;  %v323_v9 = vld [vmem:[%s255_s21] sm:$0xff]  ;;  %v324_v10 = vld [vmem:[%s255_s21 + $0x8] sm:$0xff]  ;;  %s1186_s12 = sand.u32 1, %s900_s20   ;;  %s567_s6 = sshll.u32 %s932_s27, 3 }
  0x5b   : > { %v310_v2 = vshrl.u32 %v309_v0, 7  ;;  %s562_s16 = sshll.u32 %s1186_s12, 3  ;;  %s390_s18 = scalar_lea.hbm %s1262_s3, %s567_s6 }
  0x5c   : > { %s281_s24 = scalar_lea.vmem [#allocation11], %s562_s16  ;;  %s394_s9 = sshll.u32 %s390_s18, 4  ;;  %s395_s9 = int_to_ptr.hbm [resolvable:$true] %s394_s9 }
  0x5d   : > { %v311_v3 = vadd.s32 8, %v310_v2  ;;  %v313_v4 = vadd.s32 %v312_v1, %v310_v2  ;;  %s392_s5 = sshll.u32 %s281_s24, 4  ;;  %s404_s11 = scalar_lea.hbm %s1263_s4, %s567_s6  ;;  %s393_s5 = int_to_ptr.vmem [resolvable:$true] %s392_s5 }
  0x5e   : > { %s375_s0 = scalar_lea.sflag [#allocation8], %s1186_s12  ;;  %s786_s27 = sshra.s32 %s395_s9, 4  ;;  %s787_s27 = int_to_ptr.hbm [resolvable:$true] %s786_s27 }
  0x5f   : > { %v314_v5 = vadd.s32 %v312_v1, %v311_v3  ;;  %v316_v6 = vstv %s315_s14  ;;  %s788_s8 = scalar_lea.hbm %s787_s27, 8  ;;  %s792_s14 = scalar_lea.hbm %s1262_s3, 16 }
  0x60   : > { %vm317_vm0 = vcmp.lt.s32.totalorder %v313_v4, %v316_v6  ;;  %p789_p8 = scmp.ne.s32.totalorder %s787_s27, %s788_s8  ;;  %p793_p9 = scmp.lt.s32.totalorder %s787_s27, %s1262_s3 }
  0x61   : > { %vm318_vm1 = vcmp.lt.s32.totalorder %v314_v5, %v316_v6  ;;  %v321_v11 = vsel %vm317_vm0, %v319_v7, 0.0  ;;  %v325_v13 = vsel %vm317_vm0, %v323_v9, 0.0  ;;  %p794_p5 = scmp.lt.s32.totalorder %s792_s14, %s788_s8 }
  0x62   : > { %v322_v12 = vsel %vm318_vm1, %v320_v8, 0.0  ;;  %v326_v14 = vsel %vm318_vm1, %v324_v10, 0.0  ;;  %v329_v15 = vmul.f32 %v325_v13, %v321_v11  ;;  %v337_v18 = vadd.f32 %v325_v13, %v321_v11  ;;  %p790_p6 = pnand %p789_p8, %p1083_p0 }
  0x63   : > { %v330_v16 = vmul.f32 %v326_v14, %v322_v12  ;;  %v338_v19 = vadd.f32 %v326_v14, %v322_v12  ;;  %p795_p2 = por %p794_p5, %p793_p9 }
  0x64   : > { %p791_p3 = pneg %p790_p6 }
  0x65   : > { %v348_v17 = vadd.f32 %v330_v16, %v329_v15  ;;  %v360_v20 = vadd.f32 %v338_v19, %v337_v18 }
  0x66   : > { %p796_p4 = pnand %p795_p2, %p791_p3 }
  0x67   : > { %349 = vadd.xlane.f32.xlu0 %v348_v17 }
  0x6f   : > { %361 = vadd.xlane.f32.xlu0 %v360_v20 }
  0xda   : > { %v350_v21 = vpop.xlane.xlu0 %349 }
  0xdb   : > { %v351_v22 = vrot.slane %v350_v21, 4 }
  0xdd   : > { %v352_v23 = vadd.f32 %v351_v22, %v350_v21 }
  0xdf   : > { %v353_v24 = vrot.slane %v352_v23, 2 }
  0xe1   : > { %v354_v25 = vadd.f32 %v353_v24, %v352_v23 }
  0xe2   : > { %v362_v26 = vpop.xlane.xlu0 %361 }
  0xe3   : > { %v363_v27 = vrot.slane %v362_v26, 4  ;;  %v355_v28 = vrot.slane %v354_v25, 1 }
  0xe5   : > { %v364_v29 = vadd.f32 %v363_v27, %v362_v26  ;;  %v356_v30 = vadd.f32 %v355_v28, %v354_v25 }
  0xe7   : > { %v365_v31 = vrot.slane %v364_v29, 2  ;;  %573 = vpush %v356_v30 }
  0xe9   : > { %v366_v32 = vadd.f32 %v365_v31, %v364_v29 }
  0xeb   : > { %v367_v33 = vrot.slane %v366_v32, 1 }
  0xed   : > { %v368_v34 = vadd.f32 %v367_v33, %v366_v32 }
  0xef   : > { %575 = vpush %v368_v34 }
 0x118   : > { %s574_s17 = spop %573 }
 0x119   : > { %v370_v35 = vstv %s574_s17 }
 0x11a   : > { %371 = vst [vmem:[%s281_s24] sm:$0xff] %v370_v35 }
 0x11b   : > { %799 = shalt.err (!%p796_p4)
}
 0x11c   : > { %581 = dma.vmem_to_hbm [thread:$0]  (%p1083_p0), %s393_s5, 128, %s395_s9, %s375_s0  }
 0x11d   : > { %s288_s6 = scalar_lea.vmem [#allocation12], %s562_s16  ;;  %s408_s24 = sshll.u32 %s404_s11, 4  ;;  %s409_s24 = int_to_ptr.hbm [resolvable:$true] %s408_s24 }
 0x11e   : > { %s406_s18 = sshll.u32 %s288_s6, 4  ;;  %s380_s13 = scalar_lea.sflag [#allocation13], %s1186_s12  ;;  %s407_s18 = int_to_ptr.vmem [resolvable:$true] %s406_s18 }
 0x11f   : > { %s814_s15 = sshra.s32 %s409_s24, 4  ;;  %s820_s5 = scalar_lea.hbm %s1263_s4, 16  ;;  %s815_s15 = int_to_ptr.hbm [resolvable:$true] %s814_s15 }
 0x120   : > { %s576_s17 = spop %575  ;;  %s816_s27 = scalar_lea.hbm %s815_s15, 8 }
 0x121   : > { %v372_v36 = vstv %s576_s17  ;;  %p817_p10 = scmp.ne.s32.totalorder %s815_s15, %s816_s27  ;;  %p821_p1 = scmp.lt.s32.totalorder %s815_s15, %s1263_s4 }
 0x122   : > { %373 = vst [vmem:[%s288_s6] sm:$0xff] %v372_v36  ;;  %p822_p12 = scmp.lt.s32.totalorder %s820_s5, %s816_s27 }
 0x123   : > { %p818_p11 = pnand %p817_p10, %p1083_p0 }
 0x124   : > { %p823_p8 = por %p822_p12, %p821_p1 }
 0x125   : > { %p819_p13 = pneg %p818_p11 }
 0x127   : > { %p824_p6 = pnand %p823_p8, %p819_p13 }
 0x129   : > { %827 = shalt.err (!%p824_p6)
}
 0x12a   : > { %582 = dma.vmem_to_hbm [thread:$0]  (%p1083_p0), %s407_s18, 128, %s409_s24, %s380_s13  }
 0x12b PF: > { %s420_s11 = sand.u32 1, %s896_s19   ;;  %p1294_p3 = scmp.ge.s32.totalorder %s940_s29, 2 }
 0x12c   : > { %s421_s0 = scalar_lea.sflag [#allocation8], %s420_s11 }
 0x12d   : > { %p593_p9 = pnand %p1294_p3, %p1089_p7 }
 0x12f   : > { %p594_p5 = pneg %p593_p9 }
 0x131   : > { %887 = dma.done.wait (%p594_p5), %s421_s0, 128  }
 0x132   : > { %889 = vsyncadd (%p594_p5), %s421_s0, 4294967168  ;;  %s431_s30 = scalar_lea.sflag [#allocation13], %s420_s11 }
 0x133   : > { %891 = dma.done.wait (%p594_p5), %s431_s30, 128  }
 0x134   : > { %893 = vsyncadd (%p594_p5), %s431_s30, 4294967168  ;;  %s35_s29 = sadd.s32 1, %s940_s29   ;;  %s1295_s7 = sld [smem:[#allocation19_spill]] }
 0x135   : > { %p32_p2 = scmp.ge.s32.totalorder %s35_s29, 4   ;;  %s1296_s21 = sld [smem:[#allocation23_spill]] }
 0x136   : > { %s1297_s14 = sld [smem:[#allocation20_spill]]  ;;  %s1301_s19 = smov %s900_s20 }
 0x137   : > { %s1298_s26 = sld [smem:[#allocation24_spill]]  ;;  %s1303_s0 = smov %s912_s22 }
 0x138   : > { %s1299_s27 = sld [smem:[#allocation21_spill]]  ;;  %s1304_s22 = smov %s916_s23 }
 0x139   : > { %s1300_s10 = sld [smem:[#allocation22_spill]]  ;;  %s1305_s23 = smov %s1135_s28 }
 0x13a   : > { %s1302_s20 = smov %s1295_s7  ;;  %s1306_s24 = smov %s924_s25 }
 0x13b   :  { %34 = sbr.rel (!%p32_p2) target bundleno = 19 (0x13), region = 111 }
 0x13c   : > { %s1307_s25 = smov %s1297_s14 }
 0x13f   : > { %s1308_s28 = smov %s1300_s10 }
 0x140   :  { %437 = vsyncpa [#allocation7], 1 }
 0x141   :  { %439 = vsyncpa [#allocation7 + $0x1], 1 }
 0x142   :  { %440 = vsyncpa [#allocation10], 1 }
 0x143   :  { %442 = vsyncpa [#allocation10 + $0x1], 1 }
 0x144   :  { %443 = vsyncpa [#allocation8], 1 }
 0x145   :  { %445 = vsyncpa [#allocation8 + $0x1], 1 }
 0x146   :  { %446 = vsyncpa [#allocation13], 1 }
 0x147   :  { %448 = vsyncpa [#allocation13 + $0x1], 1 }

</bundles_post_ra>
